<compile_context>
chip_gen: v6e
topology: v6e:2x2x1
jax: 0.10.0
libtpu: 0.0.40
codegen_flags: <defaults>
</compile_context>

<pallas_src>
import functools

import jax
import jax.numpy as jnp
import numpy as np
from jax import lax
from jax.experimental import pallas as pl
from jax.experimental.pallas import tpu as pltpu


def _triplet_kernel(margin, im_t_ref, im_k_ref, ids_i_ref, ids_k_ref,
                    out_ref, max_neg_ref, min_pos_ref):
    """One (tk keys) x (tm anchors) tile of the score matrix."""
    k = pl.program_id(1)

    @pl.when(k == 0)
    def _init():
        max_neg_ref[...] = jnp.full(max_neg_ref.shape, -jnp.inf, jnp.float32)
        # Diagonal handling: anchor-vs-itself is a positive whose score the
        # reference zeroes; its true value ||im_j||^2 >= 0, so seeding the
        # running min with 0 is exactly equivalent.
        min_pos_ref[...] = jnp.zeros(min_pos_ref.shape, jnp.float32)

    # (tk, d) @ (d, tm) -> (tk, tm).  Plain NN matmul (anchors pre-transposed
    # in the wrapper), anchors land on the lane axis, f32 accumulation.
    scores = lax.dot_general(
        im_k_ref[...], im_t_ref[...],
        dimension_numbers=(((1,), (0,)), ((), ())),
        preferred_element_type=jnp.float32)

    pos = ids_k_ref[...] == ids_i_ref[...]      # (tk, 1) == (1, tm) -> (tk, tm)

    # Single pass over the score tile: mask + column-reduce straight into the
    # lane-dense (1, tm) accumulators.
    max_neg_ref[...] = jnp.maximum(
        max_neg_ref[...],
        jnp.max(jnp.where(pos, -jnp.inf, scores), axis=0, keepdims=True))
    min_pos_ref[...] = jnp.minimum(
        min_pos_ref[...],
        jnp.min(jnp.where(pos, scores, jnp.inf), axis=0, keepdims=True))

    @pl.when(k == pl.num_programs(1) - 1)
    def _finalize():
        out_ref[...] = jnp.maximum(
            jnp.float32(margin) + max_neg_ref[...] - min_pos_ref[...],
            jnp.float32(0.0))


def _largest_aligned_divisor(n, target, align):
    """Largest t <= target with t % align == 0 and n % t == 0 (or None)."""
    t = min(target, n)
    t -= t % align
    while t >= align:
        if n % t == 0:
            return t
        t -= align
    return None


def _vmem_limit_bytes():
    """Scoped-VMEM limit: physical per-core capacity minus compiler headroom."""
    cap = 64 * 1024 * 1024          # conservative fallback (v7x per-TC VMEM)
    try:
        info = pltpu.get_tpu_info()
        cap = int(getattr(info, "vmem_capacity_bytes", cap)) or cap
    except Exception:
        pass
    cap = min(cap, 128 * 1024 * 1024)
    # 128 MiB parts (v5e/v6e) -> 112 MiB; 64 MiB parts (v7x) -> 56 MiB.
    return int(cap - max(cap // 8, 8 * 1024 * 1024))


def _select_tiles(n, d, itemsize, vmem_limit):
    """Pick (tm, tk).

    tk (key / sublane tile) stays moderate: it only amortizes per-step grid
    overhead and inflates the (tk, tm) f32 score tile, so VMEM spent on it
    does not reduce HBM traffic.  tm (anchor / lane tile) is grown as large as
    ~half the VMEM limit allows because the key rows are re-streamed from HBM
    n/tm times; it is capped at n/2 so the "parallel" row axis keeps >= 2
    blocks (both v7x TensorCores stay busy).
    """
    tk = (_largest_aligned_divisor(n, 256, 256)        # prefer 256-aligned MXU fill
          or _largest_aligned_divisor(n, 256, 128)
          or _largest_aligned_divisor(n, 512, 8)
          or n)

    budget = vmem_limit // 2

    def fits(tm):
        need = (2 * (tm + tk) * d * itemsize   # double-buffered im tiles
                + 2 * tm * tk * 4              # f32 score tile + masked temp
                + 2 * (tm + tk) * 4            # ids tiles
                + 8 * tm * 4)                  # accumulators + output block
        return need <= budget

    tm_cap = n // 2 if n // 2 >= 128 else n
    tm = None
    for align in (256, 128):                   # prefer 256-aligned (v6e/v7x MXU)
        t = _largest_aligned_divisor(n, tm_cap, align)
        while t is not None and not fits(t):
            t = _largest_aligned_divisor(n, t - align, align)
        if t is not None:
            tm = t
            break
    if tm is None:
        # Tiny or 128-unaligned batch: the lane tile must then be the full N.
        tm = n
    return tm, tk


def triplet_loss(im, ids, margin=0.0, *, tm=None, tk=None):
    """Sum over anchors of relu(margin + hardest-negative - easiest-positive)."""
    n, d = im.shape
    ids = jnp.asarray(ids).astype(jnp.int32)
    itemsize = im.dtype.itemsize

    vmem_limit = _vmem_limit_bytes()
    auto_tm, auto_tk = _select_tiles(n, d, itemsize, vmem_limit)
    tm = auto_tm if tm is None else tm
    tk = auto_tk if tk is None else tk
    assert n % tm == 0 and n % tk == 0, (n, tm, tk)
    # NOTE: if N is not a multiple of 128 the lane tile falls back to tm == N,
    # which for very large unaligned N can exceed the VMEM budget.
    # NOTE: an anchor with no in-batch negative contributes relu(-inf) == 0
    # (the numpy reference would raise on the empty max instead).

    # One-time wrapper transpose: anchors enter the kernel as (d, tm) so the
    # MXU matmul is NN and the constant-across-k anchor tile is never
    # re-transposed inside the key loop.
    im_t = im.T                      # (d, n)
    ids_row = ids.reshape(1, n)      # anchors on the lane axis
    ids_col = ids.reshape(n, 1)      # keys on the sublane axis

    grid = (n // tm, n // tk)

    cost = pl.CostEstimate(
        flops=2 * n * n * d,
        transcendentals=0,
        bytes_accessed=int(n * d * itemsize                 # anchor cols (read once)
                           + (n // tm) * n * d * itemsize   # key rows per row tile
                           + (n // tm) * n * 4 + n * 4      # ids
                           + n * 4))                        # per-anchor output

    per_anchor = pl.pallas_call(
        functools.partial(_triplet_kernel, float(margin)),
        out_shape=jax.ShapeDtypeStruct((n // tm, tm), jnp.float32),
        grid_spec=pltpu.PrefetchScalarGridSpec(
            num_scalar_prefetch=0,
            grid=grid,
            in_specs=[
                # Anchor embeddings (pre-transposed); constant across k.
                # NOTE: on v7x this spec could additionally use
                # pipeline_mode=pl.Buffered(1) to drop its second VMEM buffer.
                pl.BlockSpec((d, tm), lambda i, k: (0, i)),
                pl.BlockSpec((tk, d), lambda i, k: (k, 0)),   # key rows of im
                pl.BlockSpec((1, tm), lambda i, k: (0, i)),   # anchor ids (lanes)
                pl.BlockSpec((tk, 1), lambda i, k: (k, 0)),   # key ids (sublanes)
            ],
            out_specs=pl.BlockSpec((1, tm), lambda i, k: (i, 0)),
            scratch_shapes=[pltpu.VMEM((1, tm), jnp.float32),   # running max_neg
                            pltpu.VMEM((1, tm), jnp.float32)],  # running min_pos
        ),
        compiler_params=pltpu.CompilerParams(
            dimension_semantics=("parallel", "arbitrary"),
            vmem_limit_bytes=vmem_limit),
        cost_estimate=cost,
    )(im_t, im, ids_row, ids_col)

    return jnp.sum(per_anchor)


def _reference_triplet(im, ids, margin=0.0):
    im = np.asarray(im, dtype=np.float64)
    ids = np.asarray(ids)
    scores = im @ im.T
    np.fill_diagonal(scores, 0.0)
    cost = 0.0
    for j in range(len(ids)):
        pos = ids == ids[j]
        neg = ~pos
        cost += max(margin + scores[j][neg].max() - scores[j][pos].min(), 0.0)
    return np.float64(cost)


if __name__ == "__main__":
    key = jax.random.PRNGKey(0)
    k1, k2 = jax.random.split(key)

    # --- small toy case matching the original module's usage (f32 path) ---
    N, D = 8, 32
    im = jax.random.normal(k1, (N, D), dtype=jnp.float32)
    ids = jnp.array([0, 1, 0, 1, 2, 2, 0, 1], dtype=jnp.int32)
    loss = jax.block_until_ready(triplet_loss(im, ids, margin=0.0))
    ref = _reference_triplet(np.asarray(im), np.asarray(ids), margin=0.0)
    if not np.allclose(np.asarray(loss), ref, rtol=1e-4, atol=1e-4):
        raise AssertionError(f"f32 mismatch: pallas={loss} ref={ref}")

    # --- larger case, bf16 MXU path, automatic tile selection ---
    N2, D2 = 256, 128
    im2 = jax.random.normal(k2, (N2, D2), dtype=jnp.float32).astype(jnp.bfloat16)
    ids2 = (jnp.arange(N2) % 16).astype(jnp.int32)     # 16 identity groups
    margin2 = 0.2
    ref2 = _reference_triplet(np.asarray(im2.astype(jnp.float32)),
                              np.asarray(ids2), margin=margin2)

    loss_auto = jax.block_until_ready(triplet_loss(im2, ids2, margin=margin2))
    if not np.allclose(np.asarray(loss_auto), ref2, rtol=1e-3, atol=1e-2):
        raise AssertionError(f"bf16 auto-tile mismatch: pallas={loss_auto} ref={ref2}")

    # --- same case with explicit small tiles to exercise k-axis accumulation ---
    loss_tiled = jax.block_until_ready(
        triplet_loss(im2, ids2, margin=margin2, tm=128, tk=64))   # grid (2, 4)
    if not np.allclose(np.asarray(loss_tiled), ref2, rtol=1e-3, atol=1e-2):
        raise AssertionError(f"bf16 tiled mismatch: pallas={loss_tiled} ref={ref2}")

    print("KERNEL_OK")
</pallas_src>

<mosaic_0001>
module attributes {stable_mosaic.version = 11 : i64} {
  func.func @_triplet_kernel(%arg0: i32, %arg1: i32, %arg2: memref<32x8xf32, #tpu.memory_space<vmem>>, %arg3: memref<8x32xf32, #tpu.memory_space<vmem>>, %arg4: memref<1x8xi32, #tpu.memory_space<vmem>>, %arg5: memref<8x1xi32, #tpu.memory_space<vmem>>, %arg6: memref<1x8xf32, #tpu.memory_space<vmem>>, %arg7: memref<1x8xf32, #tpu.memory_space<vmem>>, %arg8: memref<1x8xf32, #tpu.memory_space<vmem>>) attributes {dimension_semantics = [#tpu.dimension_semantics<parallel>, #tpu.dimension_semantics<arbitrary>], iteration_bounds = array<i64: 1, 1>, scalar_prefetch = 0 : i64, scratch_operands = 2 : i64, tpu.core_type = #tpu.core_type<tc>, window_params = [{transform_indices = @transform_0, window_bounds = array<i64: 32, 8>}, {transform_indices = @transform_1, window_bounds = array<i64: 8, 32>}, {transform_indices = @transform_2, window_bounds = array<i64: 1, 8>}, {transform_indices = @transform_3, window_bounds = array<i64: 8, 1>}, {transform_indices = @transform_4, window_bounds = array<i64: 1, 8>}]} {
    %c0_i32 = arith.constant 0 : i32
    %0 = arith.cmpi eq, %arg1, %c0_i32 : i32
    %1 = arith.extui %0 : i1 to i32
    %c0_i32_0 = arith.constant 0 : i32
    %2 = arith.cmpi ne, %1, %c0_i32_0 : i32
    scf.if %2 {
      %cst_22 = arith.constant 0xFF800000 : f32
      %28 = vector.broadcast %cst_22 : f32 to vector<1x8xf32>
      %c0_23 = arith.constant 0 : index
      %c0_24 = arith.constant 0 : index
      %29 = vector.load %arg7[%c0_23, %c0_24] : memref<1x8xf32, #tpu.memory_space<vmem>>, vector<1x8xf32>
      tpu.vector_store %arg7[%c0_23, %c0_24], %28 {strides = array<i32>} : memref<1x8xf32, #tpu.memory_space<vmem>>, vector<1x8xf32>,
      %cst_25 = arith.constant 0.000000e+00 : f32
      %30 = vector.broadcast %cst_25 : f32 to vector<1x8xf32>
      %c0_26 = arith.constant 0 : index
      %c0_27 = arith.constant 0 : index
      %31 = vector.load %arg8[%c0_26, %c0_27] : memref<1x8xf32, #tpu.memory_space<vmem>>, vector<1x8xf32>
      tpu.vector_store %arg8[%c0_26, %c0_27], %30 {strides = array<i32>} : memref<1x8xf32, #tpu.memory_space<vmem>>, vector<1x8xf32>,
    } else {
    }
    %c0 = arith.constant 0 : index
    %c0_1 = arith.constant 0 : index
    %3 = vector.load %arg3[%c0, %c0_1] : memref<8x32xf32, #tpu.memory_space<vmem>>, vector<8x32xf32>
    %c0_2 = arith.constant 0 : index
    %c0_3 = arith.constant 0 : index
    %4 = vector.load %arg2[%c0_2, %c0_3] : memref<32x8xf32, #tpu.memory_space<vmem>>, vector<32x8xf32>
    %cst = arith.constant dense<0.000000e+00> : vector<8x8xf32>
    %5 = tpu.matmul %3, %4, %cst {dimension_numbers = #tpu.dot_dimension_numbers<[1], [0], [0], [1], [0, 0, 1, 1], [], []>} : vector<8x32xf32>, vector<32x8xf32>, vector<8x8xf32> -> vector<8x8xf32>
    %c0_4 = arith.constant 0 : index
    %c0_5 = arith.constant 0 : index
    %6 = vector.load %arg5[%c0_4, %c0_5] : memref<8x1xi32, #tpu.memory_space<vmem>>, vector<8x1xi32>
    %c0_6 = arith.constant 0 : index
    %c0_7 = arith.constant 0 : index
    %7 = vector.load %arg4[%c0_6, %c0_7] : memref<1x8xi32, #tpu.memory_space<vmem>>, vector<1x8xi32>
    %8 = vector.broadcast %6 : vector<8x1xi32> to vector<8x8xi32>
    %9 = vector.broadcast %7 : vector<1x8xi32> to vector<8x8xi32>
    %10 = arith.cmpi eq, %8, %9 : vector<8x8xi32>
    %c0_8 = arith.constant 0 : index
    %c0_9 = arith.constant 0 : index
    %11 = vector.load %arg7[%c0_8, %c0_9] : memref<1x8xf32, #tpu.memory_space<vmem>>, vector<1x8xf32>
    %cst_10 = arith.constant 0xFF800000 : f32
    %12 = vector.broadcast %cst_10 : f32 to vector<8x8xf32>
    %13 = arith.select %10, %12, %5 : vector<8x8xi1>, vector<8x8xf32>
    %cst_11 = arith.constant dense<0xFF800000> : vector<8xf32>
    %14 = vector.multi_reduction <maximumf>, %13, %cst_11 [0] : vector<8x8xf32> to vector<8xf32>
    %15 = vector.shape_cast %14 : vector<8xf32> to vector<1x8xf32>
    %16 = arith.maximumf %11, %15 : vector<1x8xf32>
    %c0_12 = arith.constant 0 : index
    %c0_13 = arith.constant 0 : index
    %17 = vector.load %arg7[%c0_12, %c0_13] : memref<1x8xf32, #tpu.memory_space<vmem>>, vector<1x8xf32>
    tpu.vector_store %arg7[%c0_12, %c0_13], %16 {strides = array<i32>} : memref<1x8xf32, #tpu.memory_space<vmem>>, vector<1x8xf32>,
    %c0_14 = arith.constant 0 : index
    %c0_15 = arith.constant 0 : index
    %18 = vector.load %arg8[%c0_14, %c0_15] : memref<1x8xf32, #tpu.memory_space<vmem>>, vector<1x8xf32>
    %cst_16 = arith.constant 0x7F800000 : f32
    %19 = vector.broadcast %cst_16 : f32 to vector<8x8xf32>
    %20 = arith.select %10, %5, %19 : vector<8x8xi1>, vector<8x8xf32>
    %cst_17 = arith.constant dense<0x7F800000> : vector<8xf32>
    %21 = vector.multi_reduction <minimumf>, %20, %cst_17 [0] : vector<8x8xf32> to vector<8xf32>
    %22 = vector.shape_cast %21 : vector<8xf32> to vector<1x8xf32>
    %23 = arith.minimumf %18, %22 : vector<1x8xf32>
    %c0_18 = arith.constant 0 : index
    %c0_19 = arith.constant 0 : index
    %24 = vector.load %arg8[%c0_18, %c0_19] : memref<1x8xf32, #tpu.memory_space<vmem>>, vector<1x8xf32>
    tpu.vector_store %arg8[%c0_18, %c0_19], %23 {strides = array<i32>} : memref<1x8xf32, #tpu.memory_space<vmem>>, vector<1x8xf32>,
    %c0_i32_20 = arith.constant 0 : i32
    %25 = arith.cmpi eq, %arg1, %c0_i32_20 : i32
    %26 = arith.extui %25 : i1 to i32
    %c0_i32_21 = arith.constant 0 : i32
    %27 = arith.cmpi ne, %26, %c0_i32_21 : i32
    scf.if %27 {
      %c0_22 = arith.constant 0 : index
      %c0_23 = arith.constant 0 : index
      %28 = vector.load %arg7[%c0_22, %c0_23] : memref<1x8xf32, #tpu.memory_space<vmem>>, vector<1x8xf32>
      %cst_24 = arith.constant 0.000000e+00 : f32
      %29 = vector.broadcast %cst_24 : f32 to vector<1x8xf32>
      %30 = arith.addf %29, %28 : vector<1x8xf32>
      %c0_25 = arith.constant 0 : index
      %c0_26 = arith.constant 0 : index
      %31 = vector.load %arg8[%c0_25, %c0_26] : memref<1x8xf32, #tpu.memory_space<vmem>>, vector<1x8xf32>
      %32 = arith.subf %30, %31 : vector<1x8xf32>
      %cst_27 = arith.constant 0.000000e+00 : f32
      %33 = vector.broadcast %cst_27 : f32 to vector<1x8xf32>
      %34 = arith.maximumf %32, %33 : vector<1x8xf32>
      %c0_28 = arith.constant 0 : index
      %c0_29 = arith.constant 0 : index
      %35 = vector.load %arg6[%c0_28, %c0_29] : memref<1x8xf32, #tpu.memory_space<vmem>>, vector<1x8xf32>
      tpu.vector_store %arg6[%c0_28, %c0_29], %34 {strides = array<i32>} : memref<1x8xf32, #tpu.memory_space<vmem>>, vector<1x8xf32>,
    } else {
    }
    return
  }
  func.func @transform_0(%arg0: i32, %arg1: i32) -> (i32, i32) {
    %c0_i32 = arith.constant 0 : i32
    %c0_i32_0 = arith.constant 0 : i32
    return %c0_i32, %arg0 : i32, i32
  }
  func.func @transform_1(%arg0: i32, %arg1: i32) -> (i32, i32) {
    %c0_i32 = arith.constant 0 : i32
    %c0_i32_0 = arith.constant 0 : i32
    return %arg1, %c0_i32 : i32, i32
  }
  func.func @transform_2(%arg0: i32, %arg1: i32) -> (i32, i32) {
    %c0_i32 = arith.constant 0 : i32
    %c0_i32_0 = arith.constant 0 : i32
    return %c0_i32, %arg0 : i32, i32
  }
  func.func @transform_3(%arg0: i32, %arg1: i32) -> (i32, i32) {
    %c0_i32 = arith.constant 0 : i32
    %c0_i32_0 = arith.constant 0 : i32
    return %arg1, %c0_i32 : i32, i32
  }
  func.func @transform_4(%arg0: i32, %arg1: i32) -> (i32, i32) {
    %c0_i32 = arith.constant 0 : i32
    %c0_i32_0 = arith.constant 0 : i32
    return %arg0, %c0_i32 : i32, i32
  }
}

</mosaic_0001>

<bundles_post_ra>
// kernel: tpu_custom_call.1
= control target key start
LH: loop header
LB: loop body
LE: loop exit
PB: predicated region body
PF: predicated region fallthrough
CT: control target
= control target key end

     0   :  { %v207_v1 = vmov 0.0   ;;  %vm208_vm0 = vmmov 0   ;;  %v209_v4 = vmov 0   ;;  %s266_s0 = inlined_call_operand.vmem [shape: f32[32,8], index: 0, kind: input, shape index: {}]   ;;  %s267_s1 = inlined_call_operand.vmem [shape: f32[8,32], index: 1, kind: input, shape index: {}]   ;;  %s268_s2 = inlined_call_operand.vmem [shape: s32[1,8], index: 2, kind: input, shape index: {}]   ;;  %s269_s3 = inlined_call_operand.vmem [shape: s32[8,1], index: 3, kind: input, shape index: {}]   ;;  %s270_s4 = inlined_call_operand.hbm [shape: f32[1,8], index: 4, kind: output, shape index: {}]  }
   0x1   :  { %v29_v0 = vld [vmem:[%s266_s0 + $0x18] sm:$0xff]  ;;  %168 = vmatprep.subr.mxu0 %v207_v1  ;;  %v28_v2 = vld [vmem:[%s266_s0 + $0x10] sm:$0xff]  ;;  %176 = vmatprep.mubr.msk.f32.mxu0 %vm208_vm0, %v207_v1  ;;  %v104_v3 = vld [vmem:[%s269_s3] sm:$0xff] }
   0x2   :  { %169 = vmatpush3.msra.mxu0 %v29_v0  ;;  %184 = vset.pattern.permute.xlu0 %v209_v4 }
   0x3   :  { %9 = vsyncpa [#allocation5], 0  ;;  %170 = vmatprep.subr.mxu0 %v207_v1  ;;  %v27_v5 = vld [vmem:[%s266_s0 + $0x8] sm:$0xff]  ;;  %107 = vperm.xlu0 %184, %v104_v3   ;;  %v26_v6 = vld [vmem:[%s266_s0] sm:$0xff]  ;;  %vm30_vm1 = vcmask 261120   ;;  %vm22_vm2 = vcmask 57344  }
   0x4   :  { %171 = vmatpush3.msra.mxu0 %v28_v2  ;;  %v25_v7 = vld [vmem:[%s267_s1] sm:$0xff]  ;;  %v210_v8 = vmov -inf   ;;  %24 = vst.msk [vmem:[#allocation3] sm:$0x1] %vm22_vm2, %v207_v1  ;;  %vm116_vm4 = vcmask 64512   ;;  %s211_s0 = smov [#allocation4]  }
   0x5   :  { %172 = vmatprep.subr.mxu0 %v207_v1  ;;  %23 = vst.msk [vmem:[#allocation2] sm:$0x1] %vm22_vm2, %v210_v8  ;;  %v162_v9 = vld [vmem:[%s268_s2] ss:$0 sm:$0xff]  ;;  %s153_s1 = sshll.u32 %s211_s0, 4  ;;  %s154_s1 = int_to_ptr.vmem [resolvable:$true] %s153_s1 }
   0x6   :  { %173 = vmatpush3.msra.mxu0 %v27_v5  ;;  %s185_s2 = scalar_lea.vmem %s154_s1, 16  ;;  %s189_s28 = scalar_lea.vmem %s154_s1, 32 }
   0x7   :  { %174 = vmatprep.subr.mxu0 %v207_v1  ;;  %p186_p0 = scmp.ne.s32.totalorder %s154_s1, %s185_s2  ;;  %p190_p1 = scmp.lt.s32.totalorder %s154_s1, %s154_s1 }
   0x8   :  { %175 = vmatpush3.msra.mxu0 %v26_v6  ;;  %p191_p2 = scmp.lt.s32.totalorder %s189_s28, %s185_s2 }
   0x9   :  { %177 = vmatmul.mubr.msk.f32.vlgmr.msra.gmra.mxu0 %vm30_vm1, %v25_v7 }
   0xa   :  { %p192_p3 = por %p191_p2, %p190_p1 }
   0xb   :  { %v127_v28 = vld [vmem:[#allocation3] sm:$0x1] }
   0xc   :  { %v114_v27 = vld [vmem:[#allocation2] sm:$0x1]  ;;  %p193_p4 = pnand %p192_p3, %p186_p0 }
  0x7e   :  { %v108_v10 = vpop.permute.xlu0 %107 }
  0x7f   :  { %vm113_vm3 = vcmp.eq.s32.totalorder %v108_v10, %v162_v9 }
  0xc9   :  { %v100_v11 = vpop.f32.mrf.mxu0 }
  0xca   :  { %v115_v12 = vsel %vm113_vm3, -inf, %v100_v11  ;;  %v128_v13 = vsel %vm113_vm3, %v100_v11, inf }
  0xcb   :  { %v117_v14 = vsel %vm116_vm4, %v115_v12, -inf  ;;  %v129_v15 = vsel %vm116_vm4, %v128_v13, inf  ;;  %v178_v16 = vpop.f32.mrf.mxu0 }
  0xcc   :  { %v118_v17 = vrot.slane %v117_v14, 4  ;;  %v130_v18 = vrot.slane %v129_v15, 4 }
  0xce   :  { %v119_v19 = vmax.f32 %v117_v14, %v118_v17  ;;  %v131_v20 = vmin.f32 %v129_v15, %v130_v18 }
  0xd0   :  { %v120_v21 = vrot.slane %v119_v19, 2  ;;  %v132_v22 = vrot.slane %v131_v20, 2 }
  0xd2   :  { %v121_v23 = vmax.f32 %v119_v19, %v120_v21  ;;  %v133_v24 = vmin.f32 %v131_v20, %v132_v22 }
  0xd4   :  { %v122_v25 = vrot.slane %v121_v23, 1  ;;  %v134_v26 = vrot.slane %v133_v24, 1 }
  0xd6   :  { %v123_v29 = vmax.f32 %v121_v23, %v122_v25  ;;  %v135_v30 = vmin.f32 %v133_v24, %v134_v26 }
  0xd8   :  { %v124_v31 = vmax.f32 %v114_v27, %v123_v29  ;;  %v136_v32 = vmin.f32 %v127_v28, %v135_v30 }
  0xda   :  { %126 = vst.msk [vmem:[#allocation2] sm:$0x1] %vm22_vm2, %v124_v31  ;;  %137 = vst.msk [vmem:[#allocation3] sm:$0x1] %vm22_vm2, %v136_v32 }
  0xe1   :  { %v141_v33 = vld [vmem:[#allocation2] sm:$0x1]  ;;  %v143_v34 = vld [vmem:[#allocation3] sm:$0x1] }
  0xe2   :  { %v144_v35 = vsub.f32 %v141_v33, %v143_v34 }
  0xe4   :  { %v145_v36 = vmax.f32 %v144_v35, 0.0 }
  0xe6   :  { %146 = vst.msk [vmem:[#allocation4] sm:$0x1] %vm22_vm2, %v145_v36 }
  0xe7   :  { %196 = shalt.err (!%p193_p4)
}
  0xe8   :  { %156 = dma.vmem_to_hbm [thread:$0]  %s154_s1, 16, %s270_s4, [#allocation5]  }
  0xe9   :  { %205 = dma.done.wait [#allocation5], 16  }
  0xea   :  { %206 = vsyncadd [#allocation5], 4294967280 }
  0xeb   :  { %160 = vsyncpa [#allocation5], 1 }

</bundles_post_ra>
